<compile_context>
chip_gen: v7x
topology: tpu7x:2x2x1
jax: 0.10.0
libtpu: 0.0.40
codegen_flags: <defaults>
</compile_context>

<pallas_src>
import jax
import jax.numpy as jnp
from jax.experimental import pallas as pl
from jax.experimental.pallas import tpu as pltpu

block_size = 32
dropout = 0.3          # inference: dropout is identity
n_embd = 64
n_heads = 4
head_size = n_embd // n_heads


def mha_kernel(x_ref, wqkv_ref, wp_ref, bp_ref, o_ref):
    B, T, C = x_ref.shape
    hs = C // n_heads

    # Flatten batch into rows: fuller MXU M / sublane occupancy.
    x = x_ref[...].reshape(B * T, C)                                      # bf16 (B*T, C)

    # One fused QKV projection for all heads (bf16 operands, f32 accumulation).
    qkv = jnp.dot(x, wqkv_ref[...],
                  preferred_element_type=jnp.float32)                     # f32 (B*T, 3C)
    qkv16 = qkv.astype(jnp.bfloat16)          # bf16 copy used only as MXU operands

    # Causal mask, shared across batch and heads.
    row = jax.lax.broadcasted_iota(jnp.int32, (T, T), 0)
    col = jax.lax.broadcasted_iota(jnp.int32, (T, T), 1)
    causal = (col <= row)[None]                                           # (1, T, T)
    mask_val = jnp.finfo(jnp.float32).min

    head_outs = []
    for h in range(n_heads):                      # static unroll over 4 heads
        q = qkv16[:, h * hs:(h + 1) * hs].reshape(B, T, hs)       # scale pre-folded in W_q
        k = qkv16[:, C + h * hs:C + (h + 1) * hs].reshape(B, T, hs)
        v = qkv16[:, 2 * C + h * hs:2 * C + (h + 1) * hs].reshape(B, T, hs)

        # Contract on the last dims -> no explicit k.T transpose/relayout.
        wei = jnp.einsum('bqd,bkd->bqk', q, k,
                         preferred_element_type=jnp.float32)              # f32 (B, T, T)
        wei = jnp.where(causal, wei, mask_val)
        wei = wei - jnp.max(wei, axis=-1, keepdims=True)
        p = jnp.exp(wei)
        p = p / jnp.sum(p, axis=-1, keepdims=True)     # exact normalization, f32
        # TODO(synk): attention-weight dropout (p=0.3) omitted — eval-mode identity.

        head_outs.append(
            jnp.einsum('bqk,bkd->bqd', p.astype(jnp.bfloat16), v,
                       preferred_element_type=jnp.float32))               # f32 (B, T, hs)

    # Lane-concat the 4 head outputs and run ONE fused output projection
    # (K=64 accumulation stays inside the MXU instead of 3 extra FIFO pops + adds).
    heads = jnp.concatenate(head_outs, axis=-1).reshape(B * T, C)         # f32 (B*T, C)
    out = jnp.dot(heads.astype(jnp.bfloat16), wp_ref[...],
                  preferred_element_type=jnp.float32)                     # f32 (B*T, C)
    out = out + bp_ref[...]                                               # broadcast (1, C) bias
    # TODO(synk): output dropout (p=0.3) omitted — eval-mode identity.

    # C = 64 lanes -> ~4 KB masked store; reshape to a lane-dense (*, 128) slab
    # only becomes worthwhile once C or T grows (per review).
    o_ref[...] = out.reshape(B, T, C).astype(o_ref.dtype)


def multi_head_attention(x, w_qkv, wp, bp):
    B, T, C = x.shape
    assert C == n_embd and T <= block_size
    vmem = lambda: pl.BlockSpec(memory_space=pltpu.MemorySpace.VMEM)
    return pl.pallas_call(
        mha_kernel,
        out_shape=jax.ShapeDtypeStruct((B, T, C), jnp.float32),
        in_specs=[vmem(), vmem(), vmem(), vmem()],
        out_specs=vmem(),
    )(x.astype(jnp.bfloat16), w_qkv.astype(jnp.bfloat16),
      wp.astype(jnp.bfloat16), bp.astype(jnp.float32))


def pack_qkv(wq, wk, wv):
    """Per-head (H, C, hs) Linear weights (already (in,out)) -> fused bf16 (C, 3C).

    Column layout is [ Q(all heads) | K(all heads) | V(all heads) ].  The
    attention scale n_embd**-0.5 (PyTorch's `C ** -0.5`) is folded into the Q
    columns; 1/8 is a power of two so the bf16 cast remains exact.
    """
    def stack(w):                                  # (H, C, hs) -> (C, H*hs)
        return jnp.transpose(w, (1, 0, 2)).reshape(n_embd, n_heads * head_size)
    scale = float(n_embd) ** -0.5
    packed = jnp.concatenate([stack(wq) * scale, stack(wk), stack(wv)], axis=1)
    return packed.astype(jnp.bfloat16)


def reference(x, wk, wq, wv, wp, bp):
    """Pure-JAX f32 reference mirroring the PyTorch forward (eval mode)."""
    B, T, C = x.shape
    scale = float(n_embd) ** -0.5        # module scales by C == n_embd, not head_size
    tril = jnp.tril(jnp.ones((T, T), dtype=bool))
    outs = []
    for h in range(n_heads):
        k = x @ wk[h]
        q = x @ wq[h]
        v = x @ wv[h]
        wei = (q @ jnp.swapaxes(k, -1, -2)) * scale
        wei = jnp.where(tril[None], wei, -jnp.inf)
        wei = jax.nn.softmax(wei, axis=-1)
        outs.append(wei @ v)
    cat = jnp.concatenate(outs, axis=-1)
    return cat @ wp + bp


if __name__ == "__main__":
    key = jax.random.PRNGKey(0)
    kx, kk, kq, kv, kp, kb = jax.random.split(key, 6)

    B, T, C = 2, 8, n_embd
    x = jax.random.normal(kx, (B, T, C), dtype=jnp.float32)

    # Deterministic synthetic parameters (nn.Linear weights pre-transposed to (in, out)).
    s = 0.1
    wk = s * jax.random.normal(kk, (n_heads, C, head_size), dtype=jnp.float32)
    wq = s * jax.random.normal(kq, (n_heads, C, head_size), dtype=jnp.float32)
    wv = s * jax.random.normal(kv, (n_heads, C, head_size), dtype=jnp.float32)
    wp = s * jax.random.normal(kp, (C, C), dtype=jnp.float32)
    bp = s * jax.random.normal(kb, (1, C), dtype=jnp.float32)

    # Fuse the 12 tiny per-head QKV projections into one bf16 (C, 3C) matrix (host side),
    # with the attention scale folded into the Q columns.
    w_qkv = pack_qkv(wq, wk, wv)

    out = multi_head_attention(x, w_qkv, wp, bp)
    out = jax.block_until_ready(out)

    ref = reference(x, wk, wq, wv, wp, bp)
    assert out.shape == (B, T, C)
    # Tolerance covers bf16 MXU-operand rounding (accumulation is f32; softmax is
    # exact f32) — observed error is a few 1e-3 at these magnitudes.
    assert jnp.allclose(out, ref, atol=2e-2, rtol=2e-2), "mismatch vs reference"

    print("KERNEL_OK")
</pallas_src>

<mosaic_0001>
module attributes {stable_mosaic.version = 11 : i64} {
  func.func @mha_kernel(%arg0: memref<2x8x64xbf16, #tpu.memory_space<vmem>>, %arg1: memref<64x192xbf16, #tpu.memory_space<vmem>>, %arg2: memref<64x64xbf16, #tpu.memory_space<vmem>>, %arg3: memref<1x64xf32, #tpu.memory_space<vmem>>, %arg4: memref<2x8x64xf32, #tpu.memory_space<vmem>>) attributes {dimension_semantics = [], scalar_prefetch = 0 : i64, scratch_operands = 0 : i64, tpu.core_type = #tpu.core_type<tc>} {
    %c0 = arith.constant 0 : index
    %c0_0 = arith.constant 0 : index
    %c0_1 = arith.constant 0 : index
    %0 = vector.load %arg0[%c0, %c0_0, %c0_1] : memref<2x8x64xbf16, #tpu.memory_space<vmem>>, vector<2x8x64xbf16>
    %1 = vector.shape_cast %0 : vector<2x8x64xbf16> to vector<16x64xbf16>
    %c0_2 = arith.constant 0 : index
    %c0_3 = arith.constant 0 : index
    %2 = vector.load %arg1[%c0_2, %c0_3] : memref<64x192xbf16, #tpu.memory_space<vmem>>, vector<64x192xbf16>
    %cst = arith.constant dense<0.000000e+00> : vector<16x192xf32>
    %3 = tpu.matmul %1, %2, %cst {dimension_numbers = #tpu.dot_dimension_numbers<[1], [0], [0], [1], [0, 0, 1, 1], [], []>} : vector<16x64xbf16>, vector<64x192xbf16>, vector<16x192xf32> -> vector<16x192xf32>
    %4 = arith.truncf %3 : vector<16x192xf32> to vector<16x192xbf16>
    %5 = tpu.iota {dimensions = array<i32: 0>} : vector<8x8xi32>
    %6 = tpu.iota {dimensions = array<i32: 1>} : vector<8x8xi32>
    %7 = arith.cmpi sle, %6, %5 : vector<8x8xi32>
    %8 = vector.shape_cast %7 : vector<8x8xi1> to vector<1x8x8xi1>
    %9 = vector.extract_strided_slice %4 {offsets = [0, 0], sizes = [16, 16], strides = [1, 1]} : vector<16x192xbf16> to vector<16x16xbf16>
    %10 = vector.shape_cast %9 : vector<16x16xbf16> to vector<2x8x16xbf16>
    %11 = vector.extract_strided_slice %4 {offsets = [0, 64], sizes = [16, 16], strides = [1, 1]} : vector<16x192xbf16> to vector<16x16xbf16>
    %12 = vector.shape_cast %11 : vector<16x16xbf16> to vector<2x8x16xbf16>
    %13 = vector.extract_strided_slice %4 {offsets = [0, 128], sizes = [16, 16], strides = [1, 1]} : vector<16x192xbf16> to vector<16x16xbf16>
    %14 = vector.shape_cast %13 : vector<16x16xbf16> to vector<2x8x16xbf16>
    "tpu.trace_start"() <{level = 10 : i32, message = "bqd,bkd->bqk"}> : () -> ()
    %cst_4 = arith.constant dense<0.000000e+00> : vector<2x8x8xf32>
    %15 = tpu.matmul %10, %12, %cst_4 {dimension_numbers = #tpu.dot_dimension_numbers<[2], [2], [1], [1], [0, 0, 0, 1, 1, 1], [0], [0]>} : vector<2x8x16xbf16>, vector<2x8x16xbf16>, vector<2x8x8xf32> -> vector<2x8x8xf32>
    %cst_5 = arith.constant -3.40282347E+38 : f32
    "tpu.trace_stop"() : () -> ()
    %16 = vector.shape_cast %8 : vector<1x8x8xi1> to vector<1x8x8xi1>
    %17 = vector.broadcast %16 : vector<1x8x8xi1> to vector<2x8x8xi1>
    %18 = vector.broadcast %cst_5 : f32 to vector<2x8x8xf32>
    %19 = arith.select %17, %15, %18 : vector<2x8x8xi1>, vector<2x8x8xf32>
    %cst_6 = arith.constant dense<0xFF800000> : vector<2x8xf32>
    %20 = vector.multi_reduction <maximumf>, %19, %cst_6 [2] : vector<2x8x8xf32> to vector<2x8xf32>
    %21 = vector.shape_cast %20 : vector<2x8xf32> to vector<2x8x1xf32>
    %22 = vector.broadcast %21 : vector<2x8x1xf32> to vector<2x8x8xf32>
    %23 = arith.subf %19, %22 : vector<2x8x8xf32>
    %24 = math.exp %23 : vector<2x8x8xf32>
    %cst_7 = arith.constant dense<0.000000e+00> : vector<2x8xf32>
    %25 = vector.multi_reduction <add>, %24, %cst_7 [2] : vector<2x8x8xf32> to vector<2x8xf32>
    %26 = vector.shape_cast %25 : vector<2x8xf32> to vector<2x8x1xf32>
    %27 = vector.broadcast %26 : vector<2x8x1xf32> to vector<2x8x8xf32>
    %28 = arith.divf %24, %27 : vector<2x8x8xf32>
    %29 = arith.truncf %28 : vector<2x8x8xf32> to vector<2x8x8xbf16>
    "tpu.trace_start"() <{level = 10 : i32, message = "bqk,bkd->bqd"}> : () -> ()
    %cst_8 = arith.constant dense<0.000000e+00> : vector<2x8x16xf32>
    %30 = tpu.matmul %29, %14, %cst_8 {dimension_numbers = #tpu.dot_dimension_numbers<[2], [1], [1], [2], [0, 0, 0, 1, 1, 2], [0], [0]>} : vector<2x8x8xbf16>, vector<2x8x16xbf16>, vector<2x8x16xf32> -> vector<2x8x16xf32>
    "tpu.trace_stop"() : () -> ()
    %31 = vector.extract_strided_slice %4 {offsets = [0, 16], sizes = [16, 16], strides = [1, 1]} : vector<16x192xbf16> to vector<16x16xbf16>
    %32 = vector.shape_cast %31 : vector<16x16xbf16> to vector<2x8x16xbf16>
    %33 = vector.extract_strided_slice %4 {offsets = [0, 80], sizes = [16, 16], strides = [1, 1]} : vector<16x192xbf16> to vector<16x16xbf16>
    %34 = vector.shape_cast %33 : vector<16x16xbf16> to vector<2x8x16xbf16>
    %35 = vector.extract_strided_slice %4 {offsets = [0, 144], sizes = [16, 16], strides = [1, 1]} : vector<16x192xbf16> to vector<16x16xbf16>
    %36 = vector.shape_cast %35 : vector<16x16xbf16> to vector<2x8x16xbf16>
    "tpu.trace_start"() <{level = 10 : i32, message = "bqd,bkd->bqk"}> : () -> ()
    %cst_9 = arith.constant dense<0.000000e+00> : vector<2x8x8xf32>
    %37 = tpu.matmul %32, %34, %cst_9 {dimension_numbers = #tpu.dot_dimension_numbers<[2], [2], [1], [1], [0, 0, 0, 1, 1, 1], [0], [0]>} : vector<2x8x16xbf16>, vector<2x8x16xbf16>, vector<2x8x8xf32> -> vector<2x8x8xf32>
    %cst_10 = arith.constant -3.40282347E+38 : f32
    "tpu.trace_stop"() : () -> ()
    %38 = vector.shape_cast %8 : vector<1x8x8xi1> to vector<1x8x8xi1>
    %39 = vector.broadcast %38 : vector<1x8x8xi1> to vector<2x8x8xi1>
    %40 = vector.broadcast %cst_10 : f32 to vector<2x8x8xf32>
    %41 = arith.select %39, %37, %40 : vector<2x8x8xi1>, vector<2x8x8xf32>
    %cst_11 = arith.constant dense<0xFF800000> : vector<2x8xf32>
    %42 = vector.multi_reduction <maximumf>, %41, %cst_11 [2] : vector<2x8x8xf32> to vector<2x8xf32>
    %43 = vector.shape_cast %42 : vector<2x8xf32> to vector<2x8x1xf32>
    %44 = vector.broadcast %43 : vector<2x8x1xf32> to vector<2x8x8xf32>
    %45 = arith.subf %41, %44 : vector<2x8x8xf32>
    %46 = math.exp %45 : vector<2x8x8xf32>
    %cst_12 = arith.constant dense<0.000000e+00> : vector<2x8xf32>
    %47 = vector.multi_reduction <add>, %46, %cst_12 [2] : vector<2x8x8xf32> to vector<2x8xf32>
    %48 = vector.shape_cast %47 : vector<2x8xf32> to vector<2x8x1xf32>
    %49 = vector.broadcast %48 : vector<2x8x1xf32> to vector<2x8x8xf32>
    %50 = arith.divf %46, %49 : vector<2x8x8xf32>
    %51 = arith.truncf %50 : vector<2x8x8xf32> to vector<2x8x8xbf16>
    "tpu.trace_start"() <{level = 10 : i32, message = "bqk,bkd->bqd"}> : () -> ()
    %cst_13 = arith.constant dense<0.000000e+00> : vector<2x8x16xf32>
    %52 = tpu.matmul %51, %36, %cst_13 {dimension_numbers = #tpu.dot_dimension_numbers<[2], [1], [1], [2], [0, 0, 0, 1, 1, 2], [0], [0]>} : vector<2x8x8xbf16>, vector<2x8x16xbf16>, vector<2x8x16xf32> -> vector<2x8x16xf32>
    "tpu.trace_stop"() : () -> ()
    %53 = vector.extract_strided_slice %4 {offsets = [0, 32], sizes = [16, 16], strides = [1, 1]} : vector<16x192xbf16> to vector<16x16xbf16>
    %54 = vector.shape_cast %53 : vector<16x16xbf16> to vector<2x8x16xbf16>
    %55 = vector.extract_strided_slice %4 {offsets = [0, 96], sizes = [16, 16], strides = [1, 1]} : vector<16x192xbf16> to vector<16x16xbf16>
    %56 = vector.shape_cast %55 : vector<16x16xbf16> to vector<2x8x16xbf16>
    %57 = vector.extract_strided_slice %4 {offsets = [0, 160], sizes = [16, 16], strides = [1, 1]} : vector<16x192xbf16> to vector<16x16xbf16>
    %58 = vector.shape_cast %57 : vector<16x16xbf16> to vector<2x8x16xbf16>
    "tpu.trace_start"() <{level = 10 : i32, message = "bqd,bkd->bqk"}> : () -> ()
    %cst_14 = arith.constant dense<0.000000e+00> : vector<2x8x8xf32>
    %59 = tpu.matmul %54, %56, %cst_14 {dimension_numbers = #tpu.dot_dimension_numbers<[2], [2], [1], [1], [0, 0, 0, 1, 1, 1], [0], [0]>} : vector<2x8x16xbf16>, vector<2x8x16xbf16>, vector<2x8x8xf32> -> vector<2x8x8xf32>
    %cst_15 = arith.constant -3.40282347E+38 : f32
    "tpu.trace_stop"() : () -> ()
    %60 = vector.shape_cast %8 : vector<1x8x8xi1> to vector<1x8x8xi1>
    %61 = vector.broadcast %60 : vector<1x8x8xi1> to vector<2x8x8xi1>
    %62 = vector.broadcast %cst_15 : f32 to vector<2x8x8xf32>
    %63 = arith.select %61, %59, %62 : vector<2x8x8xi1>, vector<2x8x8xf32>
    %cst_16 = arith.constant dense<0xFF800000> : vector<2x8xf32>
    %64 = vector.multi_reduction <maximumf>, %63, %cst_16 [2] : vector<2x8x8xf32> to vector<2x8xf32>
    %65 = vector.shape_cast %64 : vector<2x8xf32> to vector<2x8x1xf32>
    %66 = vector.broadcast %65 : vector<2x8x1xf32> to vector<2x8x8xf32>
    %67 = arith.subf %63, %66 : vector<2x8x8xf32>
    %68 = math.exp %67 : vector<2x8x8xf32>
    %cst_17 = arith.constant dense<0.000000e+00> : vector<2x8xf32>
    %69 = vector.multi_reduction <add>, %68, %cst_17 [2] : vector<2x8x8xf32> to vector<2x8xf32>
    %70 = vector.shape_cast %69 : vector<2x8xf32> to vector<2x8x1xf32>
    %71 = vector.broadcast %70 : vector<2x8x1xf32> to vector<2x8x8xf32>
    %72 = arith.divf %68, %71 : vector<2x8x8xf32>
    %73 = arith.truncf %72 : vector<2x8x8xf32> to vector<2x8x8xbf16>
    "tpu.trace_start"() <{level = 10 : i32, message = "bqk,bkd->bqd"}> : () -> ()
    %cst_18 = arith.constant dense<0.000000e+00> : vector<2x8x16xf32>
    %74 = tpu.matmul %73, %58, %cst_18 {dimension_numbers = #tpu.dot_dimension_numbers<[2], [1], [1], [2], [0, 0, 0, 1, 1, 2], [0], [0]>} : vector<2x8x8xbf16>, vector<2x8x16xbf16>, vector<2x8x16xf32> -> vector<2x8x16xf32>
    "tpu.trace_stop"() : () -> ()
    %75 = vector.extract_strided_slice %4 {offsets = [0, 48], sizes = [16, 16], strides = [1, 1]} : vector<16x192xbf16> to vector<16x16xbf16>
    %76 = vector.shape_cast %75 : vector<16x16xbf16> to vector<2x8x16xbf16>
    %77 = vector.extract_strided_slice %4 {offsets = [0, 112], sizes = [16, 16], strides = [1, 1]} : vector<16x192xbf16> to vector<16x16xbf16>
    %78 = vector.shape_cast %77 : vector<16x16xbf16> to vector<2x8x16xbf16>
    %79 = vector.extract_strided_slice %4 {offsets = [0, 176], sizes = [16, 16], strides = [1, 1]} : vector<16x192xbf16> to vector<16x16xbf16>
    %80 = vector.shape_cast %79 : vector<16x16xbf16> to vector<2x8x16xbf16>
    "tpu.trace_start"() <{level = 10 : i32, message = "bqd,bkd->bqk"}> : () -> ()
    %cst_19 = arith.constant dense<0.000000e+00> : vector<2x8x8xf32>
    %81 = tpu.matmul %76, %78, %cst_19 {dimension_numbers = #tpu.dot_dimension_numbers<[2], [2], [1], [1], [0, 0, 0, 1, 1, 1], [0], [0]>} : vector<2x8x16xbf16>, vector<2x8x16xbf16>, vector<2x8x8xf32> -> vector<2x8x8xf32>
    %cst_20 = arith.constant -3.40282347E+38 : f32
    "tpu.trace_stop"() : () -> ()
    %82 = vector.shape_cast %8 : vector<1x8x8xi1> to vector<1x8x8xi1>
    %83 = vector.broadcast %82 : vector<1x8x8xi1> to vector<2x8x8xi1>
    %84 = vector.broadcast %cst_20 : f32 to vector<2x8x8xf32>
    %85 = arith.select %83, %81, %84 : vector<2x8x8xi1>, vector<2x8x8xf32>
    %cst_21 = arith.constant dense<0xFF800000> : vector<2x8xf32>
    %86 = vector.multi_reduction <maximumf>, %85, %cst_21 [2] : vector<2x8x8xf32> to vector<2x8xf32>
    %87 = vector.shape_cast %86 : vector<2x8xf32> to vector<2x8x1xf32>
    %88 = vector.broadcast %87 : vector<2x8x1xf32> to vector<2x8x8xf32>
    %89 = arith.subf %85, %88 : vector<2x8x8xf32>
    %90 = math.exp %89 : vector<2x8x8xf32>
    %cst_22 = arith.constant dense<0.000000e+00> : vector<2x8xf32>
    %91 = vector.multi_reduction <add>, %90, %cst_22 [2] : vector<2x8x8xf32> to vector<2x8xf32>
    %92 = vector.shape_cast %91 : vector<2x8xf32> to vector<2x8x1xf32>
    %93 = vector.broadcast %92 : vector<2x8x1xf32> to vector<2x8x8xf32>
    %94 = arith.divf %90, %93 : vector<2x8x8xf32>
    %95 = arith.truncf %94 : vector<2x8x8xf32> to vector<2x8x8xbf16>
    "tpu.trace_start"() <{level = 10 : i32, message = "bqk,bkd->bqd"}> : () -> ()
    %cst_23 = arith.constant dense<0.000000e+00> : vector<2x8x16xf32>
    %96 = tpu.matmul %95, %80, %cst_23 {dimension_numbers = #tpu.dot_dimension_numbers<[2], [1], [1], [2], [0, 0, 0, 1, 1, 2], [0], [0]>} : vector<2x8x8xbf16>, vector<2x8x16xbf16>, vector<2x8x16xf32> -> vector<2x8x16xf32>
    "tpu.trace_stop"() : () -> ()
    %97 = tpu.concatenate %30, %52, %74, %96 in 2 : vector<2x8x16xf32>, vector<2x8x16xf32>, vector<2x8x16xf32>, vector<2x8x16xf32> -> vector<2x8x64xf32>
    %98 = vector.shape_cast %97 : vector<2x8x64xf32> to vector<16x64xf32>
    %99 = arith.truncf %98 : vector<16x64xf32> to vector<16x64xbf16>
    %c0_24 = arith.constant 0 : index
    %c0_25 = arith.constant 0 : index
    %100 = vector.load %arg2[%c0_24, %c0_25] : memref<64x64xbf16, #tpu.memory_space<vmem>>, vector<64x64xbf16>
    %cst_26 = arith.constant dense<0.000000e+00> : vector<16x64xf32>
    %101 = tpu.matmul %99, %100, %cst_26 {dimension_numbers = #tpu.dot_dimension_numbers<[1], [0], [0], [1], [0, 0, 1, 1], [], []>} : vector<16x64xbf16>, vector<64x64xbf16>, vector<16x64xf32> -> vector<16x64xf32>
    %c0_27 = arith.constant 0 : index
    %c0_28 = arith.constant 0 : index
    %102 = vector.load %arg3[%c0_27, %c0_28] : memref<1x64xf32, #tpu.memory_space<vmem>>, vector<1x64xf32>
    %103 = vector.broadcast %102 : vector<1x64xf32> to vector<16x64xf32>
    %104 = arith.addf %101, %103 : vector<16x64xf32>
    %105 = vector.shape_cast %104 : vector<16x64xf32> to vector<2x8x64xf32>
    %c0_29 = arith.constant 0 : index
    %c0_30 = arith.constant 0 : index
    %c0_31 = arith.constant 0 : index
    %106 = vector.load %arg4[%c0_29, %c0_30, %c0_31] : memref<2x8x64xf32, #tpu.memory_space<vmem>>, vector<2x8x64xf32>
    tpu.vector_store %arg4[%c0_29, %c0_30, %c0_31], %105 {strides = array<i32>} : memref<2x8x64xf32, #tpu.memory_space<vmem>>, vector<2x8x64xf32>,
    return
  }
}

</mosaic_0001>

<bundles_post_ra>
// kernel: tpu_custom_call.1
= control target key start
LH: loop header
LB: loop body
LE: loop exit
PB: predicated region body
PF: predicated region fallthrough
CT: control target
= control target key end

     0   :  { %9 = vsyncpa [#allocation3], 0  ;;  %s1865_s0 = inlined_call_operand.hbm [shape: bf16[2,8,64], index: 0, kind: input, shape index: {}]   ;;  %s1866_s1 = inlined_call_operand.hbm [shape: bf16[64,192], index: 1, kind: input, shape index: {}]   ;;  %s1867_s2 = inlined_call_operand.hbm [shape: bf16[64,64], index: 2, kind: input, shape index: {}]   ;;  %s1868_s3 = inlined_call_operand.vmem [shape: f32[1,64], index: 3, kind: input, shape index: {}]   ;;  %s1869_s4 = inlined_call_operand.hbm [shape: f32[2,8,64], index: 4, kind: output, shape index: {}]  }
   0x1   :  { %10 = vsyncpa [#allocation6], 0 }
   0x2   :  { %11 = vsyncpa [#allocation4], 0  ;;  %s1560_s15 = smov [#allocation5]   ;;  %s1466_s19 = scalar_lea.hbm %s1866_s1, 1024 }
   0x3   :  { %s29_s16 = sshll.u32 %s1560_s15, 4  ;;  %p1467_p0 = scmp.ne.s32.totalorder %s1866_s1, %s1466_s19  ;;  %s30_s16 = int_to_ptr.vmem [resolvable:$true] %s29_s16 }
   0x4   :  { %p1470_p1 = scmp.lt.u32.totalorder %s1466_s19, %s1866_s1 }
   0x6   :  { %p1472_p2 = pnand %p1470_p1, %p1467_p0 }
   0x8   :  { %1475 = shalt.err (!%p1472_p2)
}
   0x9   :  { %s1476_s24 = scalar_lea.vmem %s30_s16, 1024  ;;  %p1481_p4 = scmp.lt.s32.totalorder %s30_s16, %s30_s16 }
   0xa   :  { %p1477_p3 = scmp.ne.s32.totalorder %s30_s16, %s1476_s24  ;;  %p1482_p5 = scmp.lt.s32.totalorder %s1476_s24, %s1476_s24 }
   0xc   :  { %p1483_p6 = por %p1482_p5, %p1481_p4 }
   0xe   :  { %p1484_p7 = pnand %p1483_p6, %p1477_p3 }
  0x10   :  { %1487 = shalt.err (!%p1484_p7)
}
  0x11   :  { %s1561_s25 = smov 128   ;;  %s1562_s26 = smov 8  }
  0x12   :  { %35 = dma.hbm_to_vmem [thread:$0]  %s1866_s1, 1024, %s30_s16, [#allocation6], %s1561_s25, %s1561_s25, %s1562_s26  }
  0x13   :  { %s1563_s29 = smov [#allocation2]   ;;  %s1488_s7 = scalar_lea.hbm %s1865_s0, 128 }
  0x14   :  { %s17_s30 = sshll.u32 %s1563_s29, 4  ;;  %p1489_p8 = scmp.ne.s32.totalorder %s1865_s0, %s1488_s7  ;;  %s18_s30 = int_to_ptr.vmem [resolvable:$true] %s17_s30 }
  0x15   :  { %p1492_p9 = scmp.lt.u32.totalorder %s1488_s7, %s1865_s0 }
  0x17   :  { %p1494_p10 = pnand %p1492_p9, %p1489_p8 }
  0x19   :  { %1497 = shalt.err (!%p1494_p10)
}
  0x1a   :  { %s1498_s12 = scalar_lea.vmem %s18_s30, 128  ;;  %p1503_p12 = scmp.lt.s32.totalorder %s18_s30, %s18_s30 }
  0x1b   :  { %p1499_p11 = scmp.ne.s32.totalorder %s18_s30, %s1498_s12  ;;  %p1504_p13 = scmp.lt.s32.totalorder %s1498_s12, %s1498_s12 }
  0x1d   :  { %p1505_p0 = por %p1504_p13, %p1503_p12 }
  0x1f   :  { %p1506_p1 = pnand %p1505_p0, %p1499_p11 }
  0x21   :  { %1509 = shalt.err (!%p1506_p1)
}
  0x22   :  { %s1564_s1 = smov 64   ;;  %s1565_s13 = smov 4  }
  0x23   :  { %23 = dma.hbm_to_vmem [thread:$0]  %s1865_s0, 128, %s18_s30, [#allocation3], %s1564_s1, %s1564_s1, %s1565_s13  }
  0x24   :  { %s1566_s16 = smov [#allocation7]   ;;  %s1510_s20 = scalar_lea.hbm %s1867_s2, 512 }
  0x25   :  { %s41_s17 = sshll.u32 %s1566_s16, 4  ;;  %p1511_p2 = scmp.ne.s32.totalorder %s1867_s2, %s1510_s20  ;;  %s42_s17 = int_to_ptr.vmem [resolvable:$true] %s41_s17 }
  0x26   :  { %p1514_p3 = scmp.lt.u32.totalorder %s1510_s20, %s1867_s2 }
  0x28   :  { %p1516_p4 = pnand %p1514_p3, %p1511_p2 }
  0x2a   :  { %1519 = shalt.err (!%p1516_p4)
}
  0x2b   :  { %s1520_s27 = scalar_lea.vmem %s42_s17, 512  ;;  %p1525_p6 = scmp.lt.s32.totalorder %s42_s17, %s42_s17 }
  0x2c   :  { %p1521_p5 = scmp.ne.s32.totalorder %s42_s17, %s1520_s27  ;;  %p1526_p7 = scmp.lt.s32.totalorder %s1520_s27, %s1520_s27 }
  0x2e   :  { %p1527_p8 = por %p1526_p7, %p1525_p6 }
  0x30   :  { %p1528_p9 = pnand %p1527_p8, %p1521_p5 }
  0x32   :  { %1531 = shalt.err (!%p1528_p9)
}
  0x33   :  { %47 = dma.hbm_to_vmem [thread:$0]  %s1867_s2, 512, %s42_s17, [#allocation6], %s1564_s1, %s1564_s1, %s1565_s13  }
  0x34   :  { %1554 = dma.done.wait [#allocation3], 128  }
  0x35   :  { %1555 = vsyncadd [#allocation3], 4294967168 }
  0x36   :  { %1556 = dma.done.wait [#allocation6], 1536  }
  0x37   :  { %1557 = vsyncadd [#allocation6], 4294965760  ;;  %v1567_v0 = vmov 0   ;;  %v1417_v1 = vld [vmem:[#allocation5 + $0x4] ss:$8 sps:$4 sm:$0xff]   ;;  %v1429_v9 = vld [vmem:[#allocation2] sm:$0xff]   ;;  %v164_v23 = vlaneseq }
  0x38   :  { %151 = vmatprep.mubr.bf16.mxu0 %v1567_v0  ;;  %v1419_v2 = vld [vmem:[#allocation5] ss:$8 sps:$4 sm:$0xff]   ;;  %119 = vmatprep.subr.bf16.mxu0 %v1417_v1  ;;  %v1420_v3 = vld [vmem:[#allocation5 + $0x14] ss:$8 sps:$4 sm:$0xff]   ;;  %v1422_v4 = vld [vmem:[#allocation5 + $0x10] ss:$8 sps:$4 sm:$0xff]  }
  0x39   :  { %120 = vmatpush1.bf16.msra.mxu0 %v1419_v2  ;;  %v1423_v5 = vld [vmem:[#allocation5 + $0x24] ss:$8 sps:$4 sm:$0xff]   ;;  %v1425_v6 = vld [vmem:[#allocation5 + $0x20] ss:$8 sps:$4 sm:$0xff]   ;;  %v1426_v7 = vld [vmem:[#allocation5 + $0x34] ss:$8 sps:$4 sm:$0xff]  }
  0x3a   :  { %121 = vmatprep.subr.bf16.mxu0 %v1420_v3  ;;  %v1428_v8 = vld [vmem:[#allocation5 + $0x30] ss:$8 sps:$4 sm:$0xff]   ;;  %vm115_vm0 = vcmask 523264   ;;  %v1568_v10 = vmov 0.0   ;;  %vm1569_vm1 = vmmov 0   ;;  %vm181_vm2 = vcmask 130048  }
  0x3b   :  { %1277 = vmatprep.subr.bf16.mxu1 %v1568_v10  ;;  %1279 = vmatprep.mubr.msk.bf16.mxu1 %vm1569_vm1, %v1568_v10  ;;  %vm308_vm3 = vcmask 1043456   ;;  %v165_v24 = vshrl.u32 %v164_v23, 7  ;;  %v167_v25 = vand.u32 127, %v164_v23  ;;  %vm280_vm5 = vcmask 64512   ;;  %s1570_s2 = smov 48   ;;  %s1571_s29 = smov 112  }
  0x3c   :  { %s1572_s30 = smov 32   ;;  %s1573_s5 = smov 96   ;;  %vm1090_vm6 = vcmask 261120   ;;  %vm1093_vm7 = vcmask 392192  }
  0x3d   :  { %122 = vmatpush1.bf16.msra.mxu0 %v1422_v4  ;;  %vm1679_vm4 = vcmp.le.s32.totalorder %v167_v25, %v165_v24  ;;  %s1574_s6 = smov 16   ;;  %s1575_s7 = smov 80  }
  0x3e   :  { %123 = vmatprep.subr.bf16.mxu0 %v1423_v5  ;;  %s1576_s10 = smov [#allocation8]  }
  0x3f   :  { %s1187_s11 = sshll.u32 %s1576_s10, 4  ;;  %s1188_s11 = int_to_ptr.vmem [resolvable:$true] %s1187_s11 }
  0x40   :  { %s1532_s12 = scalar_lea.vmem %s1188_s11, 256  ;;  %p1537_p11 = scmp.lt.s32.totalorder %s1188_s11, %s1188_s11 }
  0x41   :  { %124 = vmatpush1.bf16.msra.mxu0 %v1425_v6  ;;  %p1533_p10 = scmp.ne.s32.totalorder %s1188_s11, %s1532_s12  ;;  %p1538_p12 = scmp.lt.s32.totalorder %s1532_s12, %s1532_s12 }
  0x42   :  { %125 = vmatprep.subr.bf16.mxu0 %v1426_v7 }
  0x43   :  { %p1539_p13 = por %p1538_p12, %p1537_p11 }
  0x45   :  { %126 = vmatpush1.bf16.msra.mxu0 %v1428_v8  ;;  %p1540_p0 = pnand %p1539_p13, %p1533_p10 }
  0x46   :  { %1301 = vmatprep.subr.bf16.mxu0 %v1568_v10 }
  0x48   :  { %1209 = vmatmul.mubr.msk.bf16.vlgmr.msra.gmra.mrb[0].mxu0 %vm115_vm0, %v1429_v9 }
  0x49   :  { %1303 = vmatprep.mubr.msk.bf16.mxu0 %vm1569_vm1, %v1568_v10 }
 0x11b   :  { %v153_v11 = vpop.f32.mrb[0].mxu0 }
 0x11c   :  { %v1652_v12 = vpack.c.bf16 %v153_v11, %v153_v11  ;;  %v155_v13 = vpop.f32.mrb[1].mxu0 }
 0x11d   :  { %v157_v14 = vpop.f32.mrb[2].mxu0  ;;  %v1670_v21 = vpack.c.bf16 %v155_v13, %v155_v13 }
 0x11e   :  { %179 = vrot.lane.b32.xlu0 %v1652_v12, %s1564_s1  ;;  %v1656_v15 = vpop.f32.mrb[3].mxu0  ;;  %v1658_v16 = vpack.c.bf16 %v157_v14, %v157_v14 }
 0x11f   :  { %v310_v22 = vsel %vm308_vm3, %v1670_v21, 0  ;;  %v1703_v55 = vpack.c.bf16 %v1656_v15, %v1656_v15 }
 0x121   :  { %v356_v59 = vsel %vm308_vm3, %v1703_v55, 0 }
 0x122   :  { %228 = vrot.lane.b32.xlu0 %v1658_v16, %s1564_s1 }
 0x190   :  { %v180_v17 = vpop.permute.xlu0 %179 }
 0x191   :  { %v186_v18 = vsel %vm181_vm2, %v180_v17, 0 }
 0x192   :  { %1278 = vmatpush3.bf16.xpose.msra.mxu1 %v186_v18 }
 0x193   :  { %1283 = vmatprep.subr.bf16.mxu1 %v1568_v10 }
 0x194   :  { %v229_v19 = vpop.permute.xlu0 %228 }
 0x195   :  { %v234_v20 = vsel %vm181_vm2, %v229_v19, 0 }
 0x199   :  { %1280 = vmatmul.mubr.msk.bf16.vlgmr.msra.gmra.mrb[0].mxu1 %vm181_vm2, %v1652_v12 }
 0x19a   :  { %1284 = vmatpush3.bf16.xpose.msra.mxu1 %v234_v20  ;;  %1285 = vmatprep.mubr.msk.bf16.mxu1 %vm1569_vm1, %v1568_v10 }
 0x19b   :  { %1289 = vmatprep.subr.bf16.mxu1 %v1568_v10 }
 0x1a1   :  { %1286 = vmatmul.mubr.msk.bf16.vlgmr.msra.gmra.mrb[4].mxu1 %vm181_vm2, %v1658_v16 }
 0x1a2   :  { %1290 = vmatpush3.bf16.msra.mxu1 %v310_v22  ;;  %1291 = vmatprep.mubr.msk.bf16.mxu1 %vm1569_vm1, %v1568_v10 }
 0x1a3   :  { %1295 = vmatprep.subr.bf16.mxu1 %v1568_v10 }
 0x26c   :  { %v222_v27 = vpop.f32.mrb[0].mxu1 }
 0x26d   :  { %v278_v28 = vsel %vm1679_vm4, %v222_v27, -3.4028235e+38  ;;  %v1281_v29 = vpop.f32.mrb[1].mxu1 }
 0x26e   :  { %v225_v30 = vpop.f32.mrb[2].mxu1  ;;  %v281_v31 = vsel %vm280_vm5, %v278_v28, -inf }
 0x26f   :  { %282 = vmax.xlane.f32.xlu1 %v281_v31  ;;  %v1282_v32 = vpop.f32.mrb[3].mxu1 }
 0x274   :  { %v270_v33 = vpop.f32.mrb[4].mxu1 }
 0x275   :  { %v279_v34 = vsel %vm1679_vm4, %v270_v33, -3.4028235e+38  ;;  %v1287_v35 = vpop.f32.mrb[5].mxu1 }
 0x276   :  { %v273_v36 = vpop.f32.mrb[6].mxu1  ;;  %v284_v37 = vsel %vm280_vm5, %v279_v34, -inf }
 0x277   :  { %285 = vmax.xlane.f32.xlu1 %v284_v37  ;;  %v1288_v38 = vpop.f32.mrb[7].mxu1 }
 0x288   :  { %400 = vrot.lane.b32.xlu1 %v1652_v12, %s1570_s2 }
 0x28c   :  { %450 = vrot.lane.b32.xlu1 %v1658_v16, %s1570_s2 }
 0x2fc   :  { %v283_v39 = vpop.xlane.xlu1 %282 }
 0x2fd   :  { %v287_v40 = vsub.f32 %v278_v28, %v283_v39 }
 0x2ff   :  { %v289_v41 = vmul.f32 1.442695, %v287_v40 }
 0x301   :  { %1434 = vpow2.f32 %v289_v41 }
 0x304   :  { %v286_v42 = vpop.xlane.xlu1 %285 }
 0x305   :  { %v288_v43 = vsub.f32 %v279_v34, %v286_v42 }
 0x307   :  { %v291_v44 = vmul.f32 1.442695, %v288_v43 }
 0x308   :  { %v401_v45 = vpop.permute.xlu1 %400 }
 0x309   :  { %1436 = vpow2.f32 %v291_v44  ;;  %v406_v46 = vsel %vm181_vm2, %v401_v45, 0 }
 0x30a   :  { %1302 = vmatpush3.bf16.xpose.msra.mxu0 %v406_v46 }
 0x30b   :  { %v1435_v47 = vpop.eup %1434  ;;  %1313 = vmatprep.subr.bf16.mxu0 %v1568_v10 }
 0x30c   :  { %v293_v48 = vsel %vm280_vm5, %v1435_v47, 0.0  ;;  %v451_v52 = vpop.permute.xlu1 %450 }
 0x30d   :  { %294 = vadd.xlane.f32.xlu0 %v293_v48  ;;  %v456_v63 = vsel %vm181_vm2, %v451_v52, 0 }
 0x313   :  { %v1437_v49 = vpop.eup %1436 }
 0x314   :  { %v296_v50 = vsel %vm280_vm5, %v1437_v49, 0.0 }
 0x315   :  { %297 = vadd.xlane.f32.xlu1 %v296_v50 }
 0x326   :  { %398 = vrot.lane.b32.xlu1 %v1652_v12, %s1571_s29 }
 0x32a   :  { %448 = vrot.lane.b32.xlu1 %v1658_v16, %s1571_s29 }
 0x39a   :  { %v295_v51 = vpop.xlane.xlu0 %294 }
 0x39b   :  { %1438 = vrcp.f32 %v295_v51 }
 0x3a2   :  { %v298_v53 = vpop.xlane.xlu1 %297 }
 0x3a3   :  { %1440 = vrcp.f32 %v298_v53 }
 0x3a5   :  { %v1439_v54 = vpop.eup %1438 }
 0x3a6   :  { %v300_v56 = vmul.f32 %v1439_v54, %v1435_v47  ;;  %v399_v57 = vpop.permute.xlu1 %398 }
 0x3a7   :  { %1304 = vmatmul.mubr.msk.bf16.vlgmr.msra.gmra.mrb[4].mxu0 %vm181_vm2, %v399_v57 }
 0x3a8   :  { %v303_v58 = vpack.c.bf16 %v300_v56, %v300_v56  ;;  %1315 = vmatprep.mubr.msk.bf16.mxu0 %vm1569_vm1, %v1568_v10 }
 0x3aa   :  { %1292 = vmatmul.mubr.msk.bf16.vlgmr.msra.gmra.mrb[8].mxu1 %vm280_vm5, %v303_v58  ;;  %v449_v0 = vpop.permute.xlu1 %448 }
 0x3ab   :  { %1296 = vmatpush3.bf16.msra.mxu1 %v356_v59  ;;  %1297 = vmatprep.mubr.msk.bf16.mxu1 %vm1569_vm1, %v1568_v10 }
 0x3ac   :  { %1307 = vmatprep.subr.bf16.mxu1 %v1568_v10 }
 0x3ad   :  { %v1441_v60 = vpop.eup %1440 }
 0x3ae   :  { %v302_v61 = vmul.f32 %v1441_v60, %v1437_v49 }
 0x3b0   :  { %v304_v62 = vpack.c.bf16 %v302_v61, %v302_v61 }
 0x3b2   :  { %1298 = vmatmul.mubr.msk.bf16.vlgmr.msra.gmra.mrb[12].mxu1 %vm280_vm5, %v304_v62 }
 0x3b3   :  { %1309 = vmatprep.mubr.msk.bf16.mxu1 %vm1569_vm1, %v1568_v10 }
 0x3b4   :  { %1308 = vmatpush3.bf16.xpose.msra.mxu1 %v456_v63 }
 0x3b5   :  { %1319 = vmatprep.subr.bf16.mxu1 %v1568_v10 }
 0x3bb   :  { %1310 = vmatmul.mubr.msk.bf16.vlgmr.msra.gmra.mrb[16].mxu1 %vm181_vm2, %v449_v0 }
 0x3bc   :  { %1321 = vmatprep.mubr.msk.bf16.mxu1 %vm1569_vm1, %v1568_v10 }
 0x47a   :  { %v442_v1 = vpop.f32.mrb[4].mxu0 }
 0x47b   :  { %v498_v2 = vsel %vm1679_vm4, %v442_v1, -3.4028235e+38  ;;  %v1305_v3 = vpop.f32.mrb[5].mxu0 }
 0x47c   :  { %v445_v4 = vpop.f32.mrb[6].mxu0  ;;  %v500_v5 = vsel %vm280_vm5, %v498_v2, -inf }
 0x47d   :  { %v1725_v6 = vpop.f32.mrb[8].mxu1  ;;  %501 = vmax.xlane.f32.xlu0 %v500_v5  ;;  %v1306_v7 = vpop.f32.mrb[7].mxu0 }
 0x47e   :  { %v1293_v8 = vpop.f32.mrb[9].mxu1 }
 0x47f   :  { %v349_v9 = vpop.f32.mrb[10].mxu1 }
 0x480   :  { %v1294_v11 = vpop.f32.mrb[11].mxu1 }
 0x485   :  { %v1727_v13 = vpop.f32.mrb[12].mxu1 }
 0x486   :  { %v1299_v14 = vpop.f32.mrb[13].mxu1 }
 0x487   :  { %v395_v15 = vpop.f32.mrb[14].mxu1 }
 0x488   :  { %v1300_v17 = vpop.f32.mrb[15].mxu1 }
 0x48e   :  { %v492_v18 = vpop.f32.mrb[16].mxu1 }
 0x48f   :  { %v499_v19 = vsel %vm1679_vm4, %v492_v18, -3.4028235e+38  ;;  %v1311_v20 = vpop.f32.mrb[17].mxu1 }
 0x490   :  { %v495_v22 = vpop.f32.mrb[18].mxu1  ;;  %v503_v23 = vsel %vm280_vm5, %v499_v19, -inf }
 0x491   :  { %504 = vmax.xlane.f32.xlu1 %v503_v23  ;;  %v1312_v24 = vpop.f32.mrb[19].mxu1 }
 0x4a2   :  { %672 = vrot.lane.b32.xlu1 %v1658_v16, %s1572_s30 }
 0x50a   :  { %v502_v25 = vpop.xlane.xlu0 %501 }
 0x50b   :  { %v506_v27 = vsub.f32 %v498_v2, %v502_v25 }
 0x50d   :  { %v508_v28 = vmul.f32 1.442695, %v506_v27 }
 0x50f   :  { %1442 = vpow2.f32 %v508_v28 }
 0x519   :  { %v1443_v29 = vpop.eup %1442 }
 0x51a   :  { %v512_v30 = vsel %vm280_vm5, %v1443_v29, 0.0 }
 0x51b   :  { %513 = vadd.xlane.f32.xlu0 %v512_v30 }
 0x51e   :  { %v505_v31 = vpop.xlane.xlu1 %504 }
 0x51f   :  { %v507_v32 = vsub.f32 %v499_v19, %v505_v31 }
 0x521   :  { %v510_v33 = vmul.f32 1.442695, %v507_v32 }
 0x522   :  { %v673_v50 = vpop.permute.xlu1 %672 }
 0x523   :  { %1444 = vpow2.f32 %v510_v33  ;;  %v678_v52 = vsel %vm181_vm2, %v673_v50, 0 }
 0x52d   :  { %v1445_v34 = vpop.eup %1444 }
 0x52e   :  { %v515_v35 = vsel %vm280_vm5, %v1445_v34, 0.0 }
 0x531   :  { %524 = vrot.lane.b32.xlu0 %v1670_v21, %s1571_s29 }
 0x535   :  { %572 = vrot.lane.b32.xlu0 %v1703_v55, %s1571_s29 }
 0x554   :  { %516 = vadd.xlane.f32.xlu0 %v515_v35 }
 0x56a   :  { %622 = vrot.lane.b32.xlu0 %v1652_v12, %s1572_s30 }
 0x56e   :  { %620 = vrot.lane.b32.xlu0 %v1652_v12, %s1573_s5 }
 0x572   :  { %670 = vrot.lane.b32.xlu0 %v1658_v16, %s1573_s5 }
 0x5a8   :  { %v514_v36 = vpop.xlane.xlu0 %513 }
 0x5a9   :  { %1446 = vrcp.f32 %v514_v36 }
 0x5ac   :  { %v525_v37 = vpop.permute.xlu0 %524 }
 0x5ad   :  { %v530_v38 = vsel %vm308_vm3, %v525_v37, 0 }
 0x5ae   :  { %1314 = vmatpush3.bf16.msra.mxu0 %v530_v38 }
 0x5af   :  { %1325 = vmatprep.subr.bf16.mxu0 %v1568_v10 }
 0x5b0   :  { %v573_v39 = vpop.permute.xlu0 %572 }
 0x5b1   :  { %v578_v40 = vsel %vm308_vm3, %v573_v39, 0 }
 0x5b2   :  { %1320 = vmatpush3.bf16.msra.mxu1 %v578_v40 }
 0x5b3   :  { %v1447_v41 = vpop.eup %1446  ;;  %1331 = vmatprep.subr.bf16.mxu1 %v1568_v10 }
 0x5b4   :  { %v519_v42 = vmul.f32 %v1447_v41, %v1443_v29 }
 0x5b6   :  { %v522_v43 = vpack.c.bf16 %v519_v42, %v519_v42 }
 0x5b8   :  { %1316 = vmatmul.mubr.msk.bf16.vlgmr.msra.gmra.mrb[8].mxu0 %vm280_vm5, %v522_v43 }
 0x5b9   :  { %1327 = vmatprep.mubr.msk.bf16.mxu0 %vm1569_vm1, %v1568_v10 }
 0x5e1   :  { %v517_v44 = vpop.xlane.xlu0 %516 }
 0x5e2   :  { %1448 = vrcp.f32 %v517_v44 }
 0x5e5   :  { %v623_v45 = vpop.permute.xlu0 %622 }
 0x5e6   :  { %v628_v46 = vsel %vm181_vm2, %v623_v45, 0 }
 0x5e7   :  { %1326 = vmatpush3.bf16.xpose.msra.mxu0 %v628_v46 }
 0x5e8   :  { %1337 = vmatprep.subr.bf16.mxu0 %v1568_v10 }
 0x5e9   :  { %v621_v49 = vpop.permute.xlu0 %620 }
 0x5ec   :  { %v1449_v47 = vpop.eup %1448 }
 0x5ed   :  { %v521_v48 = vmul.f32 %v1449_v47, %v1445_v34  ;;  %v671_v53 = vpop.permute.xlu0 %670 }
 0x5ee   :  { %1328 = vmatmul.mubr.msk.bf16.vlgmr.msra.gmra.mrb[12].mxu0 %vm181_vm2, %v621_v49 }
 0x5ef   :  { %v523_v51 = vpack.c.bf16 %v521_v48, %v521_v48  ;;  %1339 = vmatprep.mubr.msk.bf16.mxu0 %vm1569_vm1, %v1568_v10 }
 0x5f1   :  { %1322 = vmatmul.mubr.msk.bf16.vlgmr.msra.gmra.mrb[20].mxu1 %vm280_vm5, %v523_v51 }
 0x5f2   :  { %1332 = vmatpush3.bf16.xpose.msra.mxu1 %v678_v52  ;;  %1333 = vmatprep.mubr.msk.bf16.mxu1 %vm1569_vm1, %v1568_v10 }
 0x5f3   :  { %1343 = vmatprep.subr.bf16.mxu1 %v1568_v10 }
 0x5f9   :  { %1334 = vmatmul.mubr.msk.bf16.vlgmr.msra.gmra.mrb[24].mxu1 %vm181_vm2, %v671_v53 }
 0x5fa   :  { %1345 = vmatprep.mubr.msk.bf16.mxu1 %vm1569_vm1, %v1568_v10 }
 0x68b   :  { %v1766_v54 = vpop.f32.mrb[8].mxu0 }
 0x68c   :  { %v1317_v56 = vpop.f32.mrb[9].mxu0 }
 0x68d   :  { %v569_v57 = vpop.f32.mrb[10].mxu0 }
 0x68e   :  { %v1318_v58 = vpop.f32.mrb[11].mxu0 }
 0x6c1   :  { %v664_v59 = vpop.f32.mrb[12].mxu0 }
 0x6c2   :  { %v720_v60 = vsel %vm1679_vm4, %v664_v59, -3.4028235e+38  ;;  %v1329_v61 = vpop.f32.mrb[13].mxu0 }
 0x6c3   :  { %v667_v62 = vpop.f32.mrb[14].mxu0  ;;  %v722_v63 = vsel %vm280_vm5, %v720_v60, -inf }
 0x6c4   :  { %723 = vmax.xlane.f32.xlu0 %v722_v63  ;;  %v1771_v0 = vpop.f32.mrb[20].mxu1  ;;  %v1330_v1 = vpop.f32.mrb[15].mxu0 }
 0x6c5   :  { %v1402_v2 = vpack.i.bf16 %v1771_v0, %v1766_v54  ;;  %v1323_v3 = vpop.f32.mrb[21].mxu1 }
 0x6c6   :  { %v617_v4 = vpop.f32.mrb[22].mxu1 }
 0x6c7   :  { %v1324_v5 = vpop.f32.mrb[23].mxu1 }
 0x6cc   :  { %v714_v7 = vpop.f32.mrb[24].mxu1 }
 0x6cd   :  { %v721_v8 = vsel %vm1679_vm4, %v714_v7, -3.4028235e+38  ;;  %v1335_v9 = vpop.f32.mrb[25].mxu1 }
 0x6ce   :  { %v717_v11 = vpop.f32.mrb[26].mxu1  ;;  %v725_v14 = vsel %vm280_vm5, %v721_v8, -inf }
 0x6cf   :  { %726 = vmax.xlane.f32.xlu1 %v725_v14  ;;  %v1336_v15 = vpop.f32.mrb[27].mxu1 }
 0x6e0   :  { %794 = vrot.lane.b32.xlu1 %v1703_v55, %s1573_s5 }
 0x6e4   :  { %844 = vrot.lane.b32.xlu1 %v1652_v12, %s1574_s6 }
 0x6e8   :  { %842 = vrot.lane.b32.xlu1 %v1652_v12, %s1575_s7 }
 0x751   :  { %v724_v17 = vpop.xlane.xlu0 %723 }
 0x752   :  { %v728_v18 = vsub.f32 %v720_v60, %v724_v17 }
 0x754   :  { %v730_v19 = vmul.f32 1.442695, %v728_v18 }
 0x756   :  { %1450 = vpow2.f32 %v730_v19 }
 0x75c   :  { %v727_v20 = vpop.xlane.xlu1 %726 }
 0x75d   :  { %v729_v27 = vsub.f32 %v721_v8, %v727_v20 }
 0x75f   :  { %v732_v12 = vmul.f32 1.442695, %v729_v27 }
 0x760   :  { %v1451_v22 = vpop.eup %1450  ;;  %v795_v23 = vpop.permute.xlu1 %794 }
 0x761   :  { %v800_v24 = vsel %vm308_vm3, %v795_v23, 0  ;;  %v734_v25 = vsel %vm280_vm5, %v1451_v22, 0.0  ;;  %1452 = vpow2.f32 %v732_v12 }
 0x762   :  { %735 = vadd.xlane.f32.xlu0 %v734_v25  ;;  %1344 = vmatpush3.bf16.msra.mxu1 %v800_v24 }
 0x763   :  { %1355 = vmatprep.subr.bf16.mxu1 %v1568_v10 }
 0x764   :  { %v845_v35 = vpop.permute.xlu1 %844 }
 0x765   :  { %v850_v37 = vsel %vm181_vm2, %v845_v35, 0  ;;  %v1433_v35 = vld [vmem:[#allocation7 + $0x18] sm:$0xff]  }
 0x76b   :  { %v1453_v28 = vpop.eup %1452 }
 0x76c   :  { %v737_v29 = vsel %vm280_vm5, %v1453_v28, 0.0 }
 0x778   :  { %746 = vrot.lane.b32.xlu0 %v1670_v21, %s1573_s5 }
 0x797   :  { %738 = vadd.xlane.f32.xlu0 %v737_v29  ;;  %v1431_v29 = vld [vmem:[#allocation7 + $0x8] sm:$0xff]  }
 0x7ad   :  { %894 = vrot.lane.b32.xlu0 %v1658_v16, %s1574_s6 }
 0x7b1   :  { %892 = vrot.lane.b32.xlu0 %v1658_v16, %s1575_s7  ;;  %v843_v16 = vpop.permute.xlu1 %842 }
 0x7ef   :  { %v736_v30 = vpop.xlane.xlu0 %735 }
 0x7f0   :  { %1454 = vrcp.f32 %v736_v30  ;;  %v1432_v30 = vld [vmem:[#allocation7 + $0x10] sm:$0xff]  }
 0x7f3   :  { %v747_v31 = vpop.permute.xlu0 %746 }
 0x7f4   :  { %v752_v32 = vsel %vm308_vm3, %v747_v31, 0 }
 0x7f5   :  { %1338 = vmatpush3.bf16.msra.mxu0 %v752_v32 }
 0x7f6   :  { %1349 = vmatprep.subr.bf16.mxu0 %v1568_v10 }
 0x7fa   :  { %v1455_v33 = vpop.eup %1454 }
 0x7fb   :  { %v741_v34 = vmul.f32 %v1455_v33, %v1451_v22 }
 0x7fd   :  { %v744_v36 = vpack.c.bf16 %v741_v34, %v741_v34 }
 0x7ff   :  { %1340 = vmatmul.mubr.msk.bf16.vlgmr.msra.gmra.mrb[16].mxu0 %vm280_vm5, %v744_v36 }
 0x800   :  { %1350 = vmatpush3.bf16.xpose.msra.mxu0 %v850_v37  ;;  %1351 = vmatprep.mubr.msk.bf16.mxu0 %vm1569_vm1, %v1568_v10 }
 0x801   :  { %1361 = vmatprep.subr.bf16.mxu0 %v1568_v10 }
 0x807   :  { %1352 = vmatmul.mubr.msk.bf16.vlgmr.msra.gmra.mrb[20].mxu0 %vm181_vm2, %v843_v16 }
 0x808   :  { %1363 = vmatprep.mubr.msk.bf16.mxu0 %vm1569_vm1, %v1568_v10 }
 0x824   :  { %v739_v38 = vpop.xlane.xlu0 %738 }
 0x825   :  { %1456 = vrcp.f32 %v739_v38 }
 0x828   :  { %v895_v41 = vpop.permute.xlu0 %894 }
 0x829   :  { %v900_v43 = vsel %vm181_vm2, %v895_v41, 0 }
 0x82c   :  { %v893_v44 = vpop.permute.xlu0 %892 }
 0x82f   :  { %v1457_v39 = vpop.eup %1456 }
 0x830   :  { %v743_v40 = vmul.f32 %v1457_v39, %v1453_v28  ;;  %v1430_v28 = vld [vmem:[#allocation7] sm:$0xff]  }
 0x832   :  { %v745_v42 = vpack.c.bf16 %v743_v40, %v743_v40 }
 0x834   :  { %1346 = vmatmul.mubr.msk.bf16.vlgmr.msra.gmra.mrb[28].mxu1 %vm280_vm5, %v745_v42 }
 0x835   :  { %1356 = vmatpush3.bf16.xpose.msra.mxu1 %v900_v43  ;;  %1357 = vmatprep.mubr.msk.bf16.mxu1 %vm1569_vm1, %v1568_v10 }
 0x836   :  { %1367 = vmatprep.subr.bf16.mxu1 %v1568_v10 }
 0x83c   :  { %1358 = vmatmul.mubr.msk.bf16.vlgmr.msra.gmra.mrb[32].mxu1 %vm181_vm2, %v893_v44 }
 0x83d   :  { %1369 = vmatprep.mubr.msk.bf16.mxu1 %vm1569_vm1, %v1568_v10 }
 0x8d2   :  { %v788_v45 = vpop.f32.mrb[16].mxu0 }
 0x8d3   :  { %v1341_v46 = vpop.f32.mrb[17].mxu0 }
 0x8d4   :  { %v791_v47 = vpop.f32.mrb[18].mxu0 }
 0x8d5   :  { %v1342_v48 = vpop.f32.mrb[19].mxu0 }
 0x8da   :  { %v886_v49 = vpop.f32.mrb[20].mxu0 }
 0x8db   :  { %v942_v50 = vsel %vm1679_vm4, %v886_v49, -3.4028235e+38  ;;  %v1353_v51 = vpop.f32.mrb[21].mxu0 }
 0x8dc   :  { %v889_v52 = vpop.f32.mrb[22].mxu0  ;;  %v944_v53 = vsel %vm280_vm5, %v942_v50, -inf }
 0x8dd   :  { %945 = vmax.xlane.f32.xlu1 %v944_v53  ;;  %v1354_v56 = vpop.f32.mrb[23].mxu0 }
 0x907   :  { %v836_v57 = vpop.f32.mrb[28].mxu1 }
 0x908   :  { %v1407_v58 = vpack.i.bf16 %v836_v57, %v788_v45  ;;  %v1347_v59 = vpop.f32.mrb[29].mxu1 }
 0x909   :  { %v839_v60 = vpop.f32.mrb[30].mxu1 }
 0x90a   :  { %v1348_v61 = vpop.f32.mrb[31].mxu1 }
 0x90f   :  { %v936_v62 = vpop.f32.mrb[32].mxu1 }
 0x910   :  { %v943_v63 = vsel %vm1679_vm4, %v936_v62, -3.4028235e+38  ;;  %v1359_v1 = vpop.f32.mrb[33].mxu1 }
 0x911   :  { %v939_v3 = vpop.f32.mrb[34].mxu1  ;;  %v947_v4 = vsel %vm280_vm5, %v943_v63, -inf }
 0x912   :  { %948 = vmax.xlane.f32.xlu0 %v947_v4  ;;  %v1360_v5 = vpop.f32.mrb[35].mxu1 }
 0x96a   :  { %v946_v7 = vpop.xlane.xlu1 %945 }
 0x96b   :  { %v950_v8 = vsub.f32 %v942_v50, %v946_v7 }
 0x96d   :  { %v952_v9 = vmul.f32 1.442695, %v950_v8 }
 0x96f   :  { %1458 = vpow2.f32 %v952_v9 }
 0x979   :  { %v1459_v11 = vpop.eup %1458 }
 0x97a   :  { %v956_v14 = vsel %vm280_vm5, %v1459_v11, 0.0 }
 0x97b   :  { %957 = vadd.xlane.f32.xlu0 %v956_v14 }
 0x991   :  { %968 = vrot.lane.b32.xlu0 %v1670_v21, %s1575_s7 }
 0x995   :  { %1408 = vrot.lane.b32.xlu0 %v1407_v58, %s1572_s30 }
 0x99f   :  { %v949_v26 = vpop.xlane.xlu0 %948 }
 0x9a0   :  { %v951_v15 = vsub.f32 %v943_v63, %v949_v26 }
 0x9a2   :  { %v954_v17 = vmul.f32 1.442695, %v951_v15 }
 0x9a4   :  { %1460 = vpow2.f32 %v954_v17 }
 0x9ae   :  { %v1461_v18 = vpop.eup %1460 }
 0x9af   :  { %v959_v19 = vsel %vm280_vm5, %v1461_v18, 0.0 }
 0x9b0   :  { %960 = vadd.xlane.f32.xlu1 %v959_v19 }
 0x9c1   :  { %1016 = vrot.lane.b32.xlu1 %v1703_v55, %s1575_s7 }
 0x9c5   :  { %1403 = vrot.lane.b32.xlu1 %v1402_v2, %s1574_s6 }
 0xa08   :  { %v958_v20 = vpop.xlane.xlu0 %957 }
 0xa09   :  { %1462 = vrcp.f32 %v958_v20 }
 0xa0c   :  { %v969_v21 = vpop.permute.xlu0 %968 }
 0xa0d   :  { %v974_v22 = vsel %vm308_vm3, %v969_v21, 0 }
 0xa0e   :  { %1362 = vmatpush3.bf16.msra.mxu0 %v974_v22 }
 0xa0f   :  { %1373 = vmatprep.subr.bf16.mxu0 %v1568_v10 }
 0xa10   :  { %v1409_v43 = vpop.permute.xlu0 %1408 }
 0xa11   :  { %v1411_v45 = vunpack.i.h.bf16 %v1409_v43  ;;  %v1410_v46 = vunpack.i.l.bf16 %v1409_v43 }
 0xa13   :  { %v1463_v23 = vpop.eup %1462 }
 0xa14   :  { %v963_v24 = vmul.f32 %v1463_v23, %v1459_v11 }
 0xa16   :  { %v966_v25 = vpack.c.bf16 %v963_v24, %v963_v24 }
 0xa18   :  { %1364 = vmatmul.mubr.msk.bf16.vlgmr.msra.gmra.mrb[24].mxu0 %vm280_vm5, %v966_v25 }
 0xa19   :  { %1381 = vmatprep.mubr.msk.bf16.mxu0 %vm1569_vm1, %v1568_v10  ;;  %1374 = vmatpush3.bf16.msra.mxu0 %v1430_v28 }
 0xa1a   :  { %1375 = vmatprep.subr.bf16.mxu0 %v1568_v10 }
 0xa1d   :  { %1376 = vmatpush3.bf16.msra.mxu0 %v1431_v29 }
 0xa1e   :  { %1377 = vmatprep.subr.bf16.mxu0 %v1568_v10 }
 0xa21   :  { %1378 = vmatpush3.bf16.msra.mxu0 %v1432_v30 }
 0xa22   :  { %1379 = vmatprep.subr.bf16.mxu0 %v1568_v10 }
 0xa25   :  { %1380 = vmatpush3.bf16.msra.mxu0 %v1433_v35 }
 0xa3d   :  { %v961_v55 = vpop.xlane.xlu1 %960 }
 0xa3e   :  { %1464 = vrcp.f32 %v961_v55 }
 0xa41   :  { %v1017_v54 = vpop.permute.xlu1 %1016 }
 0xa42   :  { %v1022_v0 = vsel %vm308_vm3, %v1017_v54, 0 }
 0xa43   :  { %1368 = vmatpush3.bf16.msra.mxu1 %v1022_v0 }
 0xa45   :  { %v1404_v40 = vpop.permute.xlu1 %1403 }
 0xa46   :  { %v1406_v41 = vunpack.i.h.bf16 %v1404_v40  ;;  %v1405_v42 = vunpack.i.l.bf16 %v1404_v40 }
 0xa48   :  { %v1465_v2 = vpop.eup %1464  ;;  %v1089_v10 = vsel %vm181_vm2, %v1727_v13, %v1406_v41  ;;  %v1088_v44 = vsel %vm181_vm2, %v1725_v6, %v1405_v42  ;;  %v1230_v13 = vld [vmem:[%s1868_s3] ss:$0 sm:$0xff] }
 0xa49   :  { %v965_v27 = vmul.f32 %v1465_v2, %v1461_v18  ;;  %v1091_v50 = vsel %vm1090_vm6, %v1088_v44, %v1410_v46  ;;  %v1092_v51 = vsel %vm1090_vm6, %v1089_v10, %v1411_v45 }
 0xa4b   :  { %v967_v12 = vpack.c.bf16 %v965_v27, %v965_v27 }
 0xa4d   :  { %1370 = vmatmul.mubr.msk.bf16.vlgmr.msra.gmra.mrb[36].mxu1 %vm280_vm5, %v967_v12 }
 0xaeb   :  { %v1010_v31 = vpop.f32.mrb[24].mxu0 }
 0xaec   :  { %v1365_v32 = vpop.f32.mrb[25].mxu0 }
 0xaed   :  { %v1013_v33 = vpop.f32.mrb[26].mxu0 }
 0xaee   :  { %v1366_v34 = vpop.f32.mrb[27].mxu0 }
 0xb20   :  { %v1058_v36 = vpop.f32.mrb[36].mxu1 }
 0xb21   :  { %v1412_v37 = vpack.i.bf16 %v1058_v36, %v1010_v31  ;;  %v1371_v16 = vpop.f32.mrb[37].mxu1 }
 0xb22   :  { %v1061_v38 = vpop.f32.mrb[38].mxu1 }
 0xb23   :  { %1413 = vrot.lane.b32.xlu1 %v1412_v37, %s1570_s2  ;;  %v1372_v39 = vpop.f32.mrb[39].mxu1 }
 0xb95   :  { %v1414_v47 = vpop.permute.xlu1 %1413 }
 0xb96   :  { %v1416_v48 = vunpack.i.h.bf16 %v1414_v47  ;;  %v1415_v49 = vunpack.i.l.bf16 %v1414_v47 }
 0xb98   :  { %v1095_v52 = vsel %vm1093_vm7, %v1092_v51, %v1416_v48  ;;  %v1094_v53 = vsel %vm1093_vm7, %v1091_v50, %v1415_v49 }
 0xb99   :  { %v1096_v56 = vpack.c.bf16 %v1095_v52, %v1094_v53 }
 0xb9b   :  { %1382 = vmatmul.mubr.msk.bf16.vlgmr.msra.gmra.mrb[28].mxu0 %vm115_vm0, %v1096_v56 }
 0xc6e   :  { %v1173_v57 = vpop.f32.mrb[28].mxu0 }
 0xc6f   :  { %v1174_v6 = vadd.f32 %v1230_v13, %v1173_v57  ;;  %v1383_v58 = vpop.f32.mrb[29].mxu0 }
 0xc70   :  { %v1176_v59 = vpop.f32.mrb[30].mxu0 }
 0xc71   :  { %1180 = vst.msk [vmem:[#allocation8] sm:$0xff] %vm115_vm0, %v1174_v6  ;;  %v1177_v60 = vadd.f32 %v1230_v13, %v1176_v59  ;;  %v1384_v61 = vpop.f32.mrb[31].mxu0 }
 0xc73   :  { %1181 = vst.msk [vmem:[#allocation8 + $0x8] sm:$0xff] %vm115_vm0, %v1177_v60 }
 0xc74   :  { %1543 = shalt.err (!%p1540_p0)
}
 0xc75   :  { %s1544_s13 = scalar_lea.hbm %s1869_s4, 256 }
 0xc76   :  { %p1545_p1 = scmp.ne.s32.totalorder %s1869_s4, %s1544_s13  ;;  %p1548_p2 = scmp.lt.u32.totalorder %s1544_s13, %s1869_s4 }
 0xc78   :  { %p1550_p3 = pnand %p1548_p2, %p1545_p1 }
 0xc7a   :  { %1553 = shalt.err (!%p1550_p3)
}
 0xc7b   :  { %1193 = dma.vmem_to_hbm [thread:$0]  %s1188_s11, 256, %s1869_s4, [#allocation4], %s1561_s25, %s1561_s25, %s1562_s26  }
 0xc7c   :  { %1558 = dma.done.wait [#allocation4], 256  }
 0xc7d   :  { %1559 = vsyncadd [#allocation4], 4294967040 }
 0xc7e   :  { %1197 = vsyncpa [#allocation3], 1 }
 0xc7f   :  { %1198 = vsyncpa [#allocation6], 1 }
 0xc80   :  { %1199 = vsyncpa [#allocation4], 1 }

</bundles_post_ra>
